<compile_context>
chip_gen: v6e
topology: v6e:2x2x1
jax: 0.10.0
libtpu: 0.0.40
codegen_flags: <defaults>
</compile_context>

<pallas_src>
import jax
import jax.numpy as jnp
from jax.experimental import pallas as pl
from jax.experimental.pallas import tpu as pltpu


def mlp_kernel(x_ref,            # [bt, F]     f32
               w1_ref, b1_ref,   # [F, 1024]   bf16, [1, 1024] f32
               w2_ref, b2_ref,   # [1024, 128] bf16, [1, 128]  f32
               vt_ref, bt_ref,   # [1, 128]    f32,  [1, 1]    f32
               o_ref):           # [bt, 1]     f32
    x = x_ref[...].astype(jnp.bfloat16)
    # Layer 1 on the MXU: [bt, F] @ [F, 1024] -> [bt, 1024], f32 accumulation.
    h1 = jnp.dot(x, w1_ref[...],
                 preferred_element_type=jnp.float32) + b1_ref[...]
    # Dropout == identity at inference.
    # Layer 2 on the MXU (bf16 inputs, f32 accumulation): -> [bt, 128].
    h2 = jnp.dot(h1.astype(jnp.bfloat16), w2_ref[...],
                 preferred_element_type=jnp.float32) + b2_ref[...]
    # Folded layers 3-5: VPU multiply + lane reduce (MXU stays free).
    out = jnp.sum(h2 * vt_ref[...], axis=-1, keepdims=True) + bt_ref[...]
    o_ref[...] = out.astype(o_ref.dtype)                     # [bt, 1]


def init_params(key, input_size):
    """PyTorch init: weight [out, in] ~ N(0, 1/(input_size+1)), bias = 0."""
    dims = [input_size, 1024, 128, 64, 16, 1]
    std = 1.0 / (input_size + 1)
    params = []
    for i in range(len(dims) - 1):
        key, sub = jax.random.split(key)
        w = std * jax.random.normal(sub, (dims[i + 1], dims[i]), jnp.float32)
        b = jnp.zeros((dims[i + 1],), jnp.float32)
        params.append((w, b))
    return params


def fold_params(params):
    """Prepare kernel-side parameters: bf16 transposed big weights + folded tail."""
    (w1, b1), (w2, b2), (w3, b3), (w4, b4), (w5, b5) = params   # [out, in], [out]
    # Layers 3-5 composite (f32, offline): y = h2 @ a_tail.T + c_tail.
    a_tail = w5 @ w4 @ w3                                   # [1, 128]
    c_tail = w5 @ (w4 @ b3) + w5 @ b4 + b5                  # [1]
    return {
        "w1t": w1.T.astype(jnp.bfloat16),                   # [F, 1024]
        "b1": b1.reshape(1, -1),                            # [1, 1024] f32
        "w2t": w2.T.astype(jnp.bfloat16),                   # [1024, 128]
        "b2": b2.reshape(1, -1),                            # [1, 128]  f32
        "v_tail": a_tail.reshape(1, -1),                    # [1, 128]  f32
        "b_tail": c_tail.reshape(1, 1),                     # [1, 1]    f32
    }


def mlp_forward(x, fp, *, batch_tile=256):
    """x: [B, F] float32.  fp: dict from fold_params().  Returns [B, 1] f32."""
    B, F = x.shape
    # Batch tile: 256 for large batches (multiple of 128-wide v5e and 256-wide
    # v6e/v7x MXU); small batches run as one sublane-aligned tile.
    if B >= batch_tile:
        bt = batch_tile
    else:
        bt = max(8, pl.cdiv(B, 8) * 8)
    B_pad = pl.cdiv(B, bt) * bt
    if B_pad != B:
        x = jnp.pad(x, ((0, B_pad - B), (0, 0)))

    flops = 2 * B_pad * (F * 1024 + 1024 * 128 + 128)
    bytes_accessed = (B_pad * F * 4 + F * 1024 * 2 + 1024 * 128 * 2
                      + (1024 + 128 + 128 + 1) * 4 + B_pad * 4)

    out = pl.pallas_call(
        mlp_kernel,
        out_shape=jax.ShapeDtypeStruct((B_pad, 1), jnp.float32),
        grid_spec=pltpu.PrefetchScalarGridSpec(
            num_scalar_prefetch=0,
            grid=(B_pad // bt,),
            in_specs=[
                pl.BlockSpec((bt, F), lambda i: (i, 0)),
                # Grid-invariant weights/biases: constant block index (0, 0),
                # fetched once and revisited across grid steps.
                pl.BlockSpec(fp["w1t"].shape, lambda i: (0, 0)),
                pl.BlockSpec(fp["b1"].shape, lambda i: (0, 0)),
                pl.BlockSpec(fp["w2t"].shape, lambda i: (0, 0)),
                pl.BlockSpec(fp["b2"].shape, lambda i: (0, 0)),
                pl.BlockSpec(fp["v_tail"].shape, lambda i: (0, 0)),
                pl.BlockSpec(fp["b_tail"].shape, lambda i: (0, 0)),
            ],
            out_specs=pl.BlockSpec((bt, 1), lambda i: (i, 0)),
        ),
        compiler_params=pltpu.CompilerParams(
            dimension_semantics=("parallel",),
            vmem_limit_bytes=64 * 1024 * 1024,
        ),
        cost_estimate=pl.CostEstimate(
            flops=flops, transcendentals=0, bytes_accessed=bytes_accessed),
    )(x, fp["w1t"], fp["b1"], fp["w2t"], fp["b2"], fp["v_tail"], fp["b_tail"])

    return out[:B]


def reference_forward(x, params):
    """Pure-JAX f32 reference with the exact PyTorch layer structure."""
    h = x
    for (w, b) in params:           # w: [out, in], b: [out]
        h = h @ w.T + b
    return h


if __name__ == "__main__":
    key = jax.random.PRNGKey(0)
    input_size = 64
    batch = 8

    kx, kp = jax.random.split(key)
    x = jax.random.normal(kx, (batch, input_size), jnp.float32)
    params = init_params(kp, input_size)
    fp = fold_params(params)

    out = mlp_forward(x, fp)
    out = jax.block_until_ready(out)

    ref = reference_forward(x, params)
    assert out.shape == (batch, 1)
    # bf16 MXU inputs with f32 accumulation -> looser tolerance than pure f32.
    assert jnp.allclose(out, ref, rtol=5e-2, atol=1e-4), (
        f"mismatch: max abs diff {float(jnp.max(jnp.abs(out - ref)))}")

    print("KERNEL_OK")
</pallas_src>

<mosaic_0001>
module attributes {stable_mosaic.version = 11 : i64} {
  func.func @mlp_kernel(%arg0: i32, %arg1: memref<8x64xf32, #tpu.memory_space<vmem>>, %arg2: memref<64x1024xbf16, #tpu.memory_space<vmem>>, %arg3: memref<1x1024xf32, #tpu.memory_space<vmem>>, %arg4: memref<1024x128xbf16, #tpu.memory_space<vmem>>, %arg5: memref<1x128xf32, #tpu.memory_space<vmem>>, %arg6: memref<1x128xf32, #tpu.memory_space<vmem>>, %arg7: memref<1x1xf32, #tpu.memory_space<vmem>>, %arg8: memref<8x1xf32, #tpu.memory_space<vmem>>) attributes {dimension_semantics = [#tpu.dimension_semantics<parallel>], iteration_bounds = array<i64: 1>, scalar_prefetch = 0 : i64, scratch_operands = 0 : i64, tpu.core_type = #tpu.core_type<tc>, window_params = [{transform_indices = @transform_0, window_bounds = array<i64: 8, 64>}, {pipeline_mode = #tpu.pipeline_mode<synchronous>, transform_indices = @transform_1, window_bounds = array<i64: 64, 1024>}, {pipeline_mode = #tpu.pipeline_mode<synchronous>, transform_indices = @transform_2, window_bounds = array<i64: 1, 1024>}, {pipeline_mode = #tpu.pipeline_mode<synchronous>, transform_indices = @transform_3, window_bounds = array<i64: 1024, 128>}, {pipeline_mode = #tpu.pipeline_mode<synchronous>, transform_indices = @transform_4, window_bounds = array<i64: 1, 128>}, {pipeline_mode = #tpu.pipeline_mode<synchronous>, transform_indices = @transform_5, window_bounds = array<i64: 1, 128>}, {pipeline_mode = #tpu.pipeline_mode<synchronous>, transform_indices = @transform_6, window_bounds = array<i64: 1, 1>}, {transform_indices = @transform_7, window_bounds = array<i64: 8, 1>}]} {
    %c0 = arith.constant 0 : index
    %c0_0 = arith.constant 0 : index
    %0 = vector.load %arg1[%c0, %c0_0] : memref<8x64xf32, #tpu.memory_space<vmem>>, vector<8x64xf32>
    %1 = arith.truncf %0 : vector<8x64xf32> to vector<8x64xbf16>
    %c0_1 = arith.constant 0 : index
    %c0_2 = arith.constant 0 : index
    %2 = vector.load %arg2[%c0_1, %c0_2] : memref<64x1024xbf16, #tpu.memory_space<vmem>>, vector<64x1024xbf16>
    %cst = arith.constant dense<0.000000e+00> : vector<8x1024xf32>
    %3 = tpu.matmul %1, %2, %cst {dimension_numbers = #tpu.dot_dimension_numbers<[1], [0], [0], [1], [0, 0, 1, 1], [], []>} : vector<8x64xbf16>, vector<64x1024xbf16>, vector<8x1024xf32> -> vector<8x1024xf32>
    %c0_3 = arith.constant 0 : index
    %c0_4 = arith.constant 0 : index
    %4 = vector.load %arg3[%c0_3, %c0_4] : memref<1x1024xf32, #tpu.memory_space<vmem>>, vector<1x1024xf32>
    %5 = vector.broadcast %4 : vector<1x1024xf32> to vector<8x1024xf32>
    %6 = arith.addf %3, %5 : vector<8x1024xf32>
    %7 = arith.truncf %6 : vector<8x1024xf32> to vector<8x1024xbf16>
    %c0_5 = arith.constant 0 : index
    %c0_6 = arith.constant 0 : index
    %8 = vector.load %arg4[%c0_5, %c0_6] : memref<1024x128xbf16, #tpu.memory_space<vmem>>, vector<1024x128xbf16>
    %cst_7 = arith.constant dense<0.000000e+00> : vector<8x128xf32>
    %9 = tpu.matmul %7, %8, %cst_7 {dimension_numbers = #tpu.dot_dimension_numbers<[1], [0], [0], [1], [0, 0, 1, 1], [], []>} : vector<8x1024xbf16>, vector<1024x128xbf16>, vector<8x128xf32> -> vector<8x128xf32>
    %c0_8 = arith.constant 0 : index
    %c0_9 = arith.constant 0 : index
    %10 = vector.load %arg5[%c0_8, %c0_9] : memref<1x128xf32, #tpu.memory_space<vmem>>, vector<1x128xf32>
    %11 = vector.broadcast %10 : vector<1x128xf32> to vector<8x128xf32>
    %12 = arith.addf %9, %11 : vector<8x128xf32>
    %c0_10 = arith.constant 0 : index
    %c0_11 = arith.constant 0 : index
    %13 = vector.load %arg6[%c0_10, %c0_11] : memref<1x128xf32, #tpu.memory_space<vmem>>, vector<1x128xf32>
    %14 = vector.broadcast %13 : vector<1x128xf32> to vector<8x128xf32>
    %15 = arith.mulf %12, %14 : vector<8x128xf32>
    %cst_12 = arith.constant dense<0.000000e+00> : vector<8xf32>
    %16 = vector.multi_reduction <add>, %15, %cst_12 [1] : vector<8x128xf32> to vector<8xf32>
    %17 = vector.shape_cast %16 : vector<8xf32> to vector<8x1xf32>
    %c0_13 = arith.constant 0 : index
    %c0_14 = arith.constant 0 : index
    %18 = vector.load %arg7[%c0_13, %c0_14] : memref<1x1xf32, #tpu.memory_space<vmem>>, vector<1x1xf32>
    %19 = vector.broadcast %18 : vector<1x1xf32> to vector<8x1xf32>
    %20 = arith.addf %17, %19 : vector<8x1xf32>
    %c0_15 = arith.constant 0 : index
    %c0_16 = arith.constant 0 : index
    %21 = vector.load %arg8[%c0_15, %c0_16] : memref<8x1xf32, #tpu.memory_space<vmem>>, vector<8x1xf32>
    tpu.vector_store %arg8[%c0_15, %c0_16], %20 {strides = array<i32>} : memref<8x1xf32, #tpu.memory_space<vmem>>, vector<8x1xf32>,
    return
  }
  func.func @transform_0(%arg0: i32) -> (i32, i32) {
    %c0_i32 = arith.constant 0 : i32
    %c0_i32_0 = arith.constant 0 : i32
    return %arg0, %c0_i32 : i32, i32
  }
  func.func @transform_1(%arg0: i32) -> (i32, i32) {
    %c0_i32 = arith.constant 0 : i32
    %c0_i32_0 = arith.constant 0 : i32
    %c0_i32_1 = arith.constant 0 : i32
    return %c0_i32, %c0_i32_0 : i32, i32
  }
  func.func @transform_2(%arg0: i32) -> (i32, i32) {
    %c0_i32 = arith.constant 0 : i32
    %c0_i32_0 = arith.constant 0 : i32
    %c0_i32_1 = arith.constant 0 : i32
    return %c0_i32, %c0_i32_0 : i32, i32
  }
  func.func @transform_3(%arg0: i32) -> (i32, i32) {
    %c0_i32 = arith.constant 0 : i32
    %c0_i32_0 = arith.constant 0 : i32
    %c0_i32_1 = arith.constant 0 : i32
    return %c0_i32, %c0_i32_0 : i32, i32
  }
  func.func @transform_4(%arg0: i32) -> (i32, i32) {
    %c0_i32 = arith.constant 0 : i32
    %c0_i32_0 = arith.constant 0 : i32
    %c0_i32_1 = arith.constant 0 : i32
    return %c0_i32, %c0_i32_0 : i32, i32
  }
  func.func @transform_5(%arg0: i32) -> (i32, i32) {
    %c0_i32 = arith.constant 0 : i32
    %c0_i32_0 = arith.constant 0 : i32
    %c0_i32_1 = arith.constant 0 : i32
    return %c0_i32, %c0_i32_0 : i32, i32
  }
  func.func @transform_6(%arg0: i32) -> (i32, i32) {
    %c0_i32 = arith.constant 0 : i32
    %c0_i32_0 = arith.constant 0 : i32
    %c0_i32_1 = arith.constant 0 : i32
    return %c0_i32, %c0_i32_0 : i32, i32
  }
  func.func @transform_7(%arg0: i32) -> (i32, i32) {
    %c0_i32 = arith.constant 0 : i32
    %c0_i32_0 = arith.constant 0 : i32
    return %arg0, %c0_i32 : i32, i32
  }
}

</mosaic_0001>

<bundles_post_ra>
// kernel: tpu_custom_call.1
= control target key start
LH: loop header
LB: loop body
LE: loop exit
PB: predicated region body
PF: predicated region fallthrough
CT: control target
= control target key end

     0   :  { %s1649_s0 = inlined_call_operand.hbm [shape: f32[8,64], index: 0, kind: input, shape index: {}]   ;;  %s1650_s1 = inlined_call_operand.hbm [shape: bf16[64,1024], index: 1, kind: input, shape index: {}]   ;;  %s1651_s2 = inlined_call_operand.hbm [shape: f32[1,1024], index: 2, kind: input, shape index: {}]   ;;  %s1652_s3 = inlined_call_operand.hbm [shape: bf16[1024,128], index: 3, kind: input, shape index: {}]   ;;  %s1653_s4 = inlined_call_operand.vmem [shape: f32[1,128], index: 4, kind: input, shape index: {}]   ;;  %s1654_s5 = inlined_call_operand.vmem [shape: f32[1,128], index: 5, kind: input, shape index: {}]   ;;  %s1655_s6 = inlined_call_operand.<no memory space> [shape: f32[1,1], index: 6, kind: input, shape index: {}]   ;;  %s1656_s7 = inlined_call_operand.vmem [shape: f32[8,1], index: 7, kind: output, shape index: {}]  }
   0x1   :  { %v12_v0 = vstv %s1655_s6 }
   0x2   :  { %13 = vst [vmem:[#allocation2] sm:$0x1] %v12_v0 }
   0x3   :  { %14 = vsyncpa [#allocation4], 0 }
   0x4   :  { %15 = vsyncpa [#allocation6], 0 }
   0x5   :  { %16 = vsyncpa [#allocation9], 0  ;;  %s1548_s26 = smov [#allocation5]  }
   0x6   :  { %s32_s27 = sshll.u32 %s1548_s26, 4  ;;  %s33_s27 = int_to_ptr.vmem [resolvable:$true] %s32_s27 }
   0x7   :  { %s1470_s28 = scalar_lea.vmem %s33_s27, 4096  ;;  %p1475_p1 = scmp.lt.s32.totalorder %s33_s27, %s33_s27 }
   0x8   :  { %p1471_p0 = scmp.ne.s32.totalorder %s33_s27, %s1470_s28  ;;  %p1476_p2 = scmp.lt.s32.totalorder %s1470_s28, %s1470_s28 }
   0xa   :  { %p1477_p3 = por %p1476_p2, %p1475_p1 }
   0xc   :  { %p1478_p4 = pnand %p1477_p3, %p1471_p0 }
   0xe   :  { %1481 = shalt.err (!%p1478_p4)
}
   0xf   :  { %s1549_s29 = smov 512   ;;  %s1550_s30 = smov 32  }
  0x10   :  { %38 = dma.hbm_to_vmem [thread:$0]  %s1650_s1, 4096, %s33_s27, [#allocation6], %s1549_s29, %s1549_s29, %s1550_s30  }
  0x11   :  { %s1551_s6 = smov [#allocation3]   ;;  %s1552_s11 = smov [#allocation7]  }
  0x12   :  { %s23_s10 = sshll.u32 %s1551_s6, 4  ;;  %s45_s12 = sshll.u32 %s1552_s11, 4  ;;  %s24_s10 = int_to_ptr.vmem [resolvable:$true] %s23_s10  ;;  %s46_s12 = int_to_ptr.vmem [resolvable:$true] %s45_s12 }
  0x13   :  { %s1490_s13 = scalar_lea.vmem %s24_s10, 128  ;;  %p1495_p6 = scmp.lt.s32.totalorder %s24_s10, %s24_s10 }
  0x14   :  { %p1491_p5 = scmp.ne.s32.totalorder %s24_s10, %s1490_s13  ;;  %p1496_p7 = scmp.lt.s32.totalorder %s1490_s13, %s1490_s13 }
  0x16   :  { %p1497_p8 = por %p1496_p7, %p1495_p6 }
  0x18   :  { %p1498_p9 = pnand %p1497_p8, %p1491_p5 }
  0x1a   :  { %1501 = shalt.err (!%p1498_p9)
}
  0x1b   :  { %26 = dma.hbm_to_vmem [thread:$0]  %s1649_s0, 128, %s24_s10, [#allocation4]  }
  0x1c   :  { %s1510_s16 = scalar_lea.vmem %s46_s12, 128  ;;  %p1515_p11 = scmp.lt.s32.totalorder %s46_s12, %s46_s12 }
  0x1d   :  { %p1511_p10 = scmp.ne.s32.totalorder %s46_s12, %s1510_s16  ;;  %p1516_p12 = scmp.lt.s32.totalorder %s1510_s16, %s1510_s16 }
  0x1f   :  { %p1517_p13 = por %p1516_p12, %p1515_p11 }
  0x21   :  { %p1518_p0 = pnand %p1517_p13, %p1511_p10 }
  0x23   :  { %1521 = shalt.err (!%p1518_p0)
}
  0x24   :  { %48 = dma.hbm_to_vmem [thread:$0]  %s1651_s2, 128, %s46_s12, [#allocation6]  }
  0x25   :  { %s1553_s18 = smov [#allocation8]  }
  0x26   :  { %s54_s19 = sshll.u32 %s1553_s18, 4  ;;  %s55_s19 = int_to_ptr.vmem [resolvable:$true] %s54_s19 }
  0x27   :  { %s1530_s20 = scalar_lea.vmem %s55_s19, 8192  ;;  %p1535_p2 = scmp.lt.s32.totalorder %s55_s19, %s55_s19 }
  0x28   :  { %p1531_p1 = scmp.ne.s32.totalorder %s55_s19, %s1530_s20  ;;  %p1536_p3 = scmp.lt.s32.totalorder %s1530_s20, %s1530_s20 }
  0x2a   :  { %p1537_p4 = por %p1536_p3, %p1535_p2 }
  0x2c   :  { %p1538_p5 = pnand %p1537_p4, %p1531_p1 }
  0x2e   :  { %1541 = shalt.err (!%p1538_p5)
}
  0x2f   :  { %s1554_s0 = smov 64   ;;  %s1555_s21 = smov 4  }
  0x30   :  { %60 = dma.hbm_to_vmem [thread:$0]  %s1652_s3, 8192, %s55_s19, [#allocation9], %s1554_s0, %s1554_s0, %s1555_s21  }
  0x31   :  { %1542 = dma.done.wait [#allocation4], 128  }
  0x32   :  { %1543 = vsyncadd [#allocation4], 4294967168 }
  0x33   :  { %1544 = dma.done.wait [#allocation6], 4224  }
  0x34   :  { %1545 = vsyncadd [#allocation6], 4294963072 }
  0x35   :  { %1546 = dma.done.wait [#allocation9], 8192  }
  0x36   :  { %1547 = vsyncadd [#allocation9], 4294959104  ;;  %v1556_v1 = vmov 0   ;;  %v106_v2 = vld [vmem:[#allocation5 + $0xc0] sm:$0xff]  ;;  %v107_v4 = vld [vmem:[#allocation5 + $0xc8] sm:$0xff]  ;;  %vm316_vm0 = vcmask 523264  }
  0x37   :  { %352 = vmatprep.mubr.bf16.mxu0 %v1556_v1  ;;  %393 = vmatprep.mubr.bf16.mxu1 %v1556_v1  ;;  %v110_v3 = vld [vmem:[#allocation5 + $0xe0] sm:$0xff]  ;;  %v111_v6 = vld [vmem:[#allocation5 + $0xe8] sm:$0xff]  ;;  %v80_v32 = vld [vmem:[#allocation3] sm:$0xff]  ;;  %vm1189_vm1 = vcmask 7168  }
  0x38   :  { %v1223_v5 = vcombine.high %v106_v2, %v110_v3  ;;  %v1222_v7 = vcombine.low %v106_v2, %v110_v3  ;;  %v98_v8 = vld [vmem:[#allocation5 + $0x80] sm:$0xff]  ;;  %v1225_v10 = vcombine.high %v107_v4, %v111_v6  ;;  %v1224_v11 = vcombine.low %v107_v4, %v111_v6  ;;  %v99_v13 = vld [vmem:[#allocation5 + $0x88] sm:$0xff]  ;;  %v108_v33 = vld [vmem:[#allocation5 + $0xd0] sm:$0xff] }
  0x39   :  { %v102_v9 = vld [vmem:[#allocation5 + $0xa0] sm:$0xff]  ;;  %v103_v14 = vld [vmem:[#allocation5 + $0xa8] sm:$0xff]  ;;  %v112_v34 = vld [vmem:[#allocation5 + $0xf0] sm:$0xff]  ;;  %v81_v44 = vpack.c.bf16 %v80_v32, %v80_v32 }
  0x3a   :  { %v1215_v12 = vcombine.high %v98_v8, %v102_v9  ;;  %v90_v15 = vld [vmem:[#allocation5 + $0x40] sm:$0xff]  ;;  %328 = vmatprep.subr.bf16.mxu0 %v1223_v5  ;;  %v1217_v16 = vcombine.high %v99_v13, %v103_v14  ;;  %v91_v18 = vld [vmem:[#allocation5 + $0x48] sm:$0xff]  ;;  %369 = vmatprep.subr.bf16.mxu1 %v1225_v10  ;;  %v1214_v20 = vcombine.low %v98_v8, %v102_v9  ;;  %v109_v35 = vld [vmem:[#allocation5 + $0xd8] sm:$0xff] }
  0x3b   :  { %v94_v17 = vld [vmem:[#allocation5 + $0x60] sm:$0xff]  ;;  %v95_v19 = vld [vmem:[#allocation5 + $0x68] sm:$0xff]  ;;  %329 = vmatpush1.bf16.msra.mxu0 %v1222_v7  ;;  %370 = vmatpush1.bf16.msra.mxu1 %v1224_v11  ;;  %v1216_v21 = vcombine.low %v99_v13, %v103_v14  ;;  %v113_v36 = vld [vmem:[#allocation5 + $0xf8] sm:$0xff]  ;;  %v1227_v40 = vcombine.high %v108_v33, %v112_v34  ;;  %v1226_v46 = vcombine.low %v108_v33, %v112_v34 }
  0x3c   :  { %330 = vmatprep.subr.bf16.mxu0 %v1215_v12  ;;  %v1207_v22 = vcombine.high %v90_v15, %v94_v17  ;;  %371 = vmatprep.subr.bf16.mxu1 %v1217_v16  ;;  %v1209_v23 = vcombine.high %v91_v18, %v95_v19  ;;  %v82_v24 = vld [vmem:[#allocation5] sm:$0xff]  ;;  %v83_v26 = vld [vmem:[#allocation5 + $0x8] sm:$0xff]  ;;  %v1206_v28 = vcombine.low %v90_v15, %v94_v17  ;;  %v100_v38 = vld [vmem:[#allocation5 + $0x90] sm:$0xff] }
  0x3d   :  { %v86_v25 = vld [vmem:[#allocation5 + $0x20] sm:$0xff]  ;;  %v87_v27 = vld [vmem:[#allocation5 + $0x28] sm:$0xff]  ;;  %v1208_v29 = vcombine.low %v91_v18, %v95_v19  ;;  %v104_v41 = vld [vmem:[#allocation5 + $0xb0] sm:$0xff]  ;;  %v1229_v42 = vcombine.high %v109_v35, %v113_v36  ;;  %v1228_v48 = vcombine.low %v109_v35, %v113_v36 }
  0x3e   :  { %v1199_v30 = vcombine.high %v82_v24, %v86_v25  ;;  %v1201_v31 = vcombine.high %v83_v26, %v87_v27  ;;  %v1198_v37 = vcombine.low %v82_v24, %v86_v25  ;;  %v1200_v39 = vcombine.low %v83_v26, %v87_v27  ;;  %v101_v43 = vld [vmem:[#allocation5 + $0x98] sm:$0xff]  ;;  %v92_v47 = vld [vmem:[#allocation5 + $0x50] sm:$0xff]  ;;  %v1398_v4 = vld [vmem:[#allocation8 + $0x78] sm:$0xff]  }
  0x3f   :  { %331 = vmatpush1.bf16.msra.mxu0 %v1214_v20  ;;  %372 = vmatpush1.bf16.msra.mxu1 %v1216_v21  ;;  %v105_v45 = vld [vmem:[#allocation5 + $0xb8] sm:$0xff]  ;;  %v1219_v49 = vcombine.high %v100_v38, %v104_v41  ;;  %v96_v50 = vld [vmem:[#allocation5 + $0x70] sm:$0xff]  ;;  %v1218_v54 = vcombine.low %v100_v38, %v104_v41  ;;  %v1399_v6 = vld [vmem:[#allocation8 + $0xf8] sm:$0xff]   ;;  %v116_v38 = vlaneseq }
  0x40   :  { %332 = vmatprep.subr.bf16.mxu0 %v1207_v22  ;;  %373 = vmatprep.subr.bf16.mxu1 %v1209_v23  ;;  %v1221_v51 = vcombine.high %v101_v43, %v105_v45  ;;  %v93_v52 = vld [vmem:[#allocation5 + $0x58] sm:$0xff]  ;;  %v84_v55 = vld [vmem:[#allocation5 + $0x10] sm:$0xff]  ;;  %v1220_v56 = vcombine.low %v101_v43, %v105_v45  ;;  %v1211_v57 = vcombine.high %v92_v47, %v96_v50  ;;  %v1400_v7 = vld [vmem:[#allocation8 + $0x38] sm:$0xff]  }
  0x41   :  { %v97_v53 = vld [vmem:[#allocation5 + $0x78] sm:$0xff]  ;;  %v88_v58 = vld [vmem:[#allocation5 + $0x30] sm:$0xff]  ;;  %v1210_v62 = vcombine.low %v92_v47, %v96_v50  ;;  %v1401_v8 = vld [vmem:[#allocation8 + $0xb8] sm:$0xff]  }
  0x42   :  { %v1213_v59 = vcombine.high %v93_v52, %v97_v53  ;;  %v85_v60 = vld [vmem:[#allocation5 + $0x18] sm:$0xff]  ;;  %v1212_v63 = vcombine.low %v93_v52, %v97_v53  ;;  %v1203_v0 = vcombine.high %v84_v55, %v88_v58  ;;  %v1202_v3 = vcombine.low %v84_v55, %v88_v58  ;;  %v1406_v12 = vld [vmem:[#allocation8 + $0x68] sm:$0xff]   ;;  %v1410_v16 = vld [vmem:[#allocation8 + $0x60] sm:$0xff]  }
  0x43   :  { %333 = vmatpush1.bf16.msra.mxu0 %v1206_v28  ;;  %374 = vmatpush1.bf16.msra.mxu1 %v1208_v29  ;;  %v89_v61 = vld [vmem:[#allocation5 + $0x38] sm:$0xff]  ;;  %v1407_v13 = vld [vmem:[#allocation8 + $0xe8] sm:$0xff]   ;;  %v1411_v17 = vld [vmem:[#allocation8 + $0xe0] sm:$0xff]  }
  0x44   :  { %334 = vmatprep.subr.bf16.mxu0 %v1199_v30  ;;  %375 = vmatprep.subr.bf16.mxu1 %v1201_v31  ;;  %v1205_v2 = vcombine.high %v85_v60, %v89_v61  ;;  %v1204_v5 = vcombine.low %v85_v60, %v89_v61  ;;  %v1403_v9 = vld [vmem:[#allocation8 + $0xf0] sm:$0xff]   ;;  %v1408_v14 = vld [vmem:[#allocation8 + $0x28] sm:$0xff]   ;;  %v1412_v18 = vld [vmem:[#allocation8 + $0x20] sm:$0xff]  }
  0x45   :  { %v1404_v10 = vld [vmem:[#allocation8 + $0x30] sm:$0xff]   ;;  %v1409_v15 = vld [vmem:[#allocation8 + $0xa8] sm:$0xff]   ;;  %v1413_v19 = vld [vmem:[#allocation8 + $0xa0] sm:$0xff]  }
  0x46   :  { %v1405_v11 = vld [vmem:[#allocation8 + $0xb0] sm:$0xff]   ;;  %v1414_v20 = vld [vmem:[#allocation8 + $0x58] sm:$0xff]   ;;  %v1422_v28 = vld [vmem:[#allocation8 + $0x48] sm:$0xff]  }
  0x47   :  { %335 = vmatpush1.bf16.msra.mxu0 %v1198_v37  ;;  %376 = vmatpush1.bf16.msra.mxu1 %v1200_v39  ;;  %v1415_v21 = vld [vmem:[#allocation8 + $0xd8] sm:$0xff]   ;;  %v1418_v24 = vld [vmem:[#allocation8 + $0x50] sm:$0xff]   ;;  %v1423_v29 = vld [vmem:[#allocation8 + $0xc8] sm:$0xff]   ;;  %v1620_v39 = vshrl.u32 %v116_v38, 7 }
  0x48   :  { %410 = vmatprep.subr.bf16.mxu0 %v1227_v40  ;;  %451 = vmatprep.subr.bf16.mxu1 %v1229_v42  ;;  %v1416_v22 = vld [vmem:[#allocation8 + $0x18] sm:$0xff]   ;;  %v1419_v25 = vld [vmem:[#allocation8 + $0xd0] sm:$0xff]   ;;  %v1424_v30 = vld [vmem:[#allocation8 + $0x8] sm:$0xff]  }
  0x49   :  { %v1417_v23 = vld [vmem:[#allocation8 + $0x98] sm:$0xff]   ;;  %v1420_v26 = vld [vmem:[#allocation8 + $0x10] sm:$0xff]   ;;  %v1425_v31 = vld [vmem:[#allocation8 + $0x88] sm:$0xff]   ;;  %v118_v40 = vsub.s32 0, %v1620_v39  ;;  %v126_v41 = vsub.s32 2, %v1620_v39  ;;  %v122_v43 = vsub.s32 1, %v1620_v39 }
  0x4a   :  { %1230 = vmatmul.mubr.msk.bf16.vlgmr.msra.gmra.mxu0 %vm316_vm0, %v81_v44  ;;  %1231 = vmatmul.mubr.msk.bf16.vlgmr.msra.gmra.mxu1 %vm316_vm0, %v81_v44  ;;  %v1421_v27 = vld [vmem:[#allocation8 + $0x90] sm:$0xff]   ;;  %v1426_v32 = vld [vmem:[#allocation8 + $0x40] sm:$0xff]   ;;  %v1430_v36 = vld [vmem:[#allocation8 + $0x178] sm:$0xff]  }
  0x4b   :  { %411 = vmatpush1.bf16.msra.mxu0 %v1226_v46  ;;  %452 = vmatpush1.bf16.msra.mxu1 %v1228_v48  ;;  %v1427_v33 = vld [vmem:[#allocation8 + $0xc0] sm:$0xff]   ;;  %v1431_v37 = vld [vmem:[#allocation8 + $0x1f8] sm:$0xff]   ;;  %v1452_v38 = vld [vmem:[#allocation8 + $0x110] sm:$0xff]  }
  0x4c   :  { %412 = vmatprep.subr.bf16.mxu0 %v1219_v49  ;;  %453 = vmatprep.subr.bf16.mxu1 %v1221_v51  ;;  %v1428_v34 = vld [vmem:[#allocation8] sm:$0xff]   ;;  %v1624_v42 = vld [vmem:[#allocation7] sm:$0xff] }
  0x4d   :  { %434 = vmatprep.mubr.bf16.mxu0 %v1556_v1  ;;  %475 = vmatprep.mubr.bf16.mxu1 %v1556_v1  ;;  %v1402_v1 = vld [vmem:[#allocation8 + $0x70] sm:$0xff]   ;;  %v1429_v35 = vld [vmem:[#allocation8 + $0x80] sm:$0xff]   ;;  %v119_v45 = vrot.slane %v1624_v42, %v118_v40  ;;  %v127_v46 = vrot.slane %v1624_v42, %v126_v41  ;;  %v123_v47 = vrot.slane %v1624_v42, %v122_v43  ;;  %v1432_v61 = vld [vmem:[#allocation8 + $0x138] sm:$0xff]   ;;  %v134_v40 = vsub.s32 4, %v1620_v39 }
  0x4e   :  { %v1453_v41 = vld [vmem:[#allocation8 + $0x190] sm:$0xff]   ;;  %v1454_v43 = vld [vmem:[#allocation8 + $0x148] sm:$0xff]  }
  0x4f   :  { %413 = vmatpush1.bf16.msra.mxu0 %v1218_v54  ;;  %454 = vmatpush1.bf16.msra.mxu1 %v1220_v56 }
  0x50   :  { %414 = vmatprep.subr.bf16.mxu0 %v1211_v57  ;;  %455 = vmatprep.subr.bf16.mxu1 %v1213_v59 }
  0x53   :  { %415 = vmatpush1.bf16.msra.mxu0 %v1210_v62  ;;  %456 = vmatpush1.bf16.msra.mxu1 %v1212_v63 }
  0x54   :  { %416 = vmatprep.subr.bf16.mxu0 %v1203_v0  ;;  %457 = vmatprep.subr.bf16.mxu1 %v1205_v2  ;;  %v1433_v2 = vld [vmem:[#allocation8 + $0x1b8] sm:$0xff]  }
  0x57   :  { %417 = vmatpush1.bf16.msra.mxu0 %v1202_v3  ;;  %458 = vmatpush1.bf16.msra.mxu1 %v1204_v5  ;;  %v1434_v3 = vld [vmem:[#allocation8 + $0x170] sm:$0xff]  }
  0x58   :  { %1301 = vmatprep.subr.bf16.mxu0 %v1398_v4  ;;  %1323 = vmatprep.subr.bf16.mxu1 %v1399_v6  ;;  %v1435_v5 = vld [vmem:[#allocation8 + $0x1f0] sm:$0xff]  }
  0x59   :  { %v1436_v6 = vld [vmem:[#allocation8 + $0x130] sm:$0xff]  }
  0x5a   :  { %1232 = vmatmul.mubr.msk.bf16.vlgmr.msra.gmra.mxu0 %vm316_vm0, %v81_v44  ;;  %1233 = vmatmul.mubr.msk.bf16.vlgmr.msra.gmra.mxu1 %vm316_vm0, %v81_v44  ;;  %v130_v44 = vsub.s32 3, %v1620_v39 }
  0x5b   :  { %1302 = vmatpush3.bf16.msra.mxu0 %v1400_v7  ;;  %1324 = vmatpush3.bf16.msra.mxu1 %v1401_v8  ;;  %v1437_v7 = vld [vmem:[#allocation8 + $0x1b0] sm:$0xff]   ;;  %v1438_v8 = vld [vmem:[#allocation8 + $0x168] sm:$0xff]  }
  0x5c   :  { %1303 = vmatprep.subr.bf16.mxu0 %v1402_v1  ;;  %1325 = vmatprep.subr.bf16.mxu1 %v1403_v9  ;;  %v131_v49 = vrot.slane %v1624_v42, %v130_v44  ;;  %v1439_v1 = vld [vmem:[#allocation8 + $0x1e8] sm:$0xff]   ;;  %v138_v9 = vsub.s32 5, %v1620_v39 }
  0x5d   :  { %v1455_v44 = vld [vmem:[#allocation8 + $0x1c8] sm:$0xff]  }
  0x5f   :  { %1304 = vmatpush3.bf16.msra.mxu0 %v1404_v10  ;;  %1326 = vmatpush3.bf16.msra.mxu1 %v1405_v11  ;;  %v146_v10 = vsub.s32 7, %v1620_v39  ;;  %v1440_v11 = vld [vmem:[#allocation8 + $0x128] sm:$0xff]  }
  0x60   :  { %1305 = vmatprep.subr.bf16.mxu0 %v1406_v12  ;;  %1327 = vmatprep.subr.bf16.mxu1 %v1407_v13  ;;  %v1441_v12 = vld [vmem:[#allocation8 + $0x1a8] sm:$0xff]   ;;  %v1442_v13 = vld [vmem:[#allocation8 + $0x160] sm:$0xff]  }
  0x63   :  { %1306 = vmatpush3.bf16.msra.mxu0 %v1408_v14  ;;  %1328 = vmatpush3.bf16.msra.mxu1 %v1409_v15  ;;  %v1443_v14 = vld [vmem:[#allocation8 + $0x1e0] sm:$0xff]   ;;  %v139_v15 = vrot.slane %v1624_v42, %v138_v9 }
  0x64   :  { %1307 = vmatprep.subr.bf16.mxu0 %v1410_v16  ;;  %1329 = vmatprep.subr.bf16.mxu1 %v1411_v17  ;;  %v147_v17 = vrot.slane %v1624_v42, %v146_v10 }
  0x67   :  { %1308 = vmatpush3.bf16.msra.mxu0 %v1412_v18  ;;  %1330 = vmatpush3.bf16.msra.mxu1 %v1413_v19  ;;  %v1444_v18 = vld [vmem:[#allocation8 + $0x120] sm:$0xff]  }
  0x68   :  { %1309 = vmatprep.subr.bf16.mxu0 %v1414_v20  ;;  %1331 = vmatprep.subr.bf16.mxu1 %v1415_v21  ;;  %v1445_v20 = vld [vmem:[#allocation8 + $0x1a0] sm:$0xff]   ;;  %v1446_v21 = vld [vmem:[#allocation8 + $0x158] sm:$0xff]  }
  0x6b   :  { %1310 = vmatpush3.bf16.msra.mxu0 %v1416_v22  ;;  %1332 = vmatpush3.bf16.msra.mxu1 %v1417_v23  ;;  %v1447_v23 = vld [vmem:[#allocation8 + $0x1d8] sm:$0xff]  }
  0x6c   :  { %1311 = vmatprep.subr.bf16.mxu0 %v1418_v24  ;;  %1333 = vmatprep.subr.bf16.mxu1 %v1419_v25 }
  0x6f   :  { %1312 = vmatpush3.bf16.msra.mxu0 %v1420_v26  ;;  %1334 = vmatpush3.bf16.msra.mxu1 %v1421_v27 }
  0x70   :  { %1313 = vmatprep.subr.bf16.mxu0 %v1422_v28  ;;  %1335 = vmatprep.subr.bf16.mxu1 %v1423_v29  ;;  %v1448_v28 = vld [vmem:[#allocation8 + $0x118] sm:$0xff]  }
  0x73   :  { %1314 = vmatpush3.bf16.msra.mxu0 %v1424_v30  ;;  %1336 = vmatpush3.bf16.msra.mxu1 %v1425_v31  ;;  %v1449_v31 = vld [vmem:[#allocation8 + $0x198] sm:$0xff]  }
  0x74   :  { %1315 = vmatprep.subr.bf16.mxu0 %v1426_v32  ;;  %1337 = vmatprep.subr.bf16.mxu1 %v1427_v33  ;;  %v1450_v32 = vld [vmem:[#allocation8 + $0x150] sm:$0xff]  }
  0x77   :  { %1316 = vmatpush3.bf16.msra.mxu0 %v1428_v34  ;;  %1338 = vmatpush3.bf16.msra.mxu1 %v1429_v35  ;;  %v1451_v35 = vld [vmem:[#allocation8 + $0x1d0] sm:$0xff]  }
  0x78   :  { %1345 = vmatprep.subr.bf16.mxu0 %v1430_v36  ;;  %1367 = vmatprep.subr.bf16.mxu1 %v1431_v37  ;;  %v142_v37 = vsub.s32 6, %v1620_v39  ;;  %v1460_v39 = vld [vmem:[#allocation8 + $0x100] sm:$0xff]  }
 0x10a   :  { %v354_v48 = vpop.f32.mrf.mxu0  ;;  %v395_v50 = vpop.f32.mrf.mxu1 }
 0x10b   :  { %v355_v51 = vadd.f32 %v354_v48, %v119_v45  ;;  %v396_v52 = vadd.f32 %v395_v50, %v127_v46  ;;  %v143_v45 = vrot.slane %v1624_v42, %v142_v37  ;;  %v1456_v46 = vld [vmem:[#allocation8 + $0x108] sm:$0xff]   ;;  %v1459_v50 = vld [vmem:[#allocation8 + $0x1c0] sm:$0xff]  }
 0x10c   :  { %v356_v53 = vpop.f32.mrf.mxu0  ;;  %v397_v55 = vpop.f32.mrf.mxu1  ;;  %v1457_v48 = vld [vmem:[#allocation8 + $0x188] sm:$0xff]  }
 0x10d   :  { %v357_v54 = vadd.f32 %v356_v53, %v123_v47  ;;  %v398_v56 = vadd.f32 %v397_v55, %v131_v49  ;;  %v486_v58 = vpack.c.bf16 %v396_v52, %v396_v52  ;;  %v484_v62 = vpack.c.bf16 %v355_v51, %v355_v51  ;;  %v1458_v49 = vld [vmem:[#allocation8 + $0x140] sm:$0xff]  }
 0x10e   :  { %v358_v57 = vpop.f32.mrf.mxu0  ;;  %v399_v60 = vpop.f32.mrf.mxu1  ;;  %v135_v47 = vrot.slane %v1624_v42, %v134_v40  ;;  %v1461_v53 = vld [vmem:[#allocation8 + $0x180] sm:$0xff]  }
 0x10f   :  { %v485_v59 = vpack.c.bf16 %v357_v54, %v357_v54  ;;  %v487_v63 = vpack.c.bf16 %v398_v56, %v398_v56 }
 0x110   :  { %v359_v0 = vpop.f32.mrf.mxu0  ;;  %v400_v4 = vpop.f32.mrf.mxu1 }
 0x111   :  { %1043 = vmatprep.mubr.bf16.mxu0 %v485_v59  ;;  %1083 = vmatprep.mubr.bf16.mxu1 %v487_v63  ;;  %v1234_v0 = vld [vmem:[%s1653_s4] ss:$0 sm:$0xff] }
 0x112   :  { %1044 = vmatmul.mubr.bf16.vlgmr.msra.gmra.mxu0 %v484_v62  ;;  %1084 = vmatmul.mubr.bf16.vlgmr.msra.gmra.mxu1 %v486_v58 }
 0x113   :  { %1346 = vmatpush3.bf16.msra.mxu0 %v1432_v61  ;;  %1368 = vmatpush3.bf16.msra.mxu1 %v1433_v2 }
 0x114   :  { %1347 = vmatprep.subr.bf16.mxu0 %v1434_v3  ;;  %1369 = vmatprep.subr.bf16.mxu1 %v1435_v5 }
 0x117   :  { %1348 = vmatpush3.bf16.msra.mxu0 %v1436_v6  ;;  %1370 = vmatpush3.bf16.msra.mxu1 %v1437_v7 }
 0x118   :  { %1349 = vmatprep.subr.bf16.mxu0 %v1438_v8  ;;  %1371 = vmatprep.subr.bf16.mxu1 %v1439_v1 }
 0x11a   :  { %v436_v16 = vpop.f32.mrf.mxu0  ;;  %v477_v19 = vpop.f32.mrf.mxu1 }
 0x11b   :  { %1350 = vmatpush3.bf16.msra.mxu0 %v1440_v11  ;;  %1372 = vmatpush3.bf16.msra.mxu1 %v1441_v12  ;;  %v478_v51 = vadd.f32 %v477_v19, %v143_v45  ;;  %v437_v52 = vadd.f32 %v436_v16, %v135_v47 }
 0x11c   :  { %1351 = vmatprep.subr.bf16.mxu0 %v1442_v13  ;;  %v438_v22 = vpop.f32.mrf.mxu0  ;;  %1373 = vmatprep.subr.bf16.mxu1 %v1443_v14  ;;  %v479_v25 = vpop.f32.mrf.mxu1  ;;  %v1299_v14 = vld [vmem:[%s1654_s5] ss:$0 sm:$0xff] }
 0x11d   :  { %v439_v24 = vadd.f32 %v438_v22, %v139_v15  ;;  %v480_v27 = vadd.f32 %v479_v25, %v147_v17  ;;  %v490_v54 = vpack.c.bf16 %v478_v51, %v478_v51  ;;  %v488_v55 = vpack.c.bf16 %v437_v52, %v437_v52 }
 0x11e   :  { %v440_v26 = vpop.f32.mrf.mxu0  ;;  %v481_v30 = vpop.f32.mrf.mxu1 }
 0x11f   :  { %1352 = vmatpush3.bf16.msra.mxu0 %v1444_v18  ;;  %v489_v29 = vpack.c.bf16 %v439_v24, %v439_v24  ;;  %1374 = vmatpush3.bf16.msra.mxu1 %v1445_v20  ;;  %v491_v33 = vpack.c.bf16 %v480_v27, %v480_v27  ;;  %v1300_v18 = vld [vmem:[#allocation2] ss:$0 sm:$0xff] }
 0x120   :  { %1353 = vmatprep.subr.bf16.mxu0 %v1446_v21  ;;  %v441_v34 = vpop.f32.mrf.mxu0  ;;  %1375 = vmatprep.subr.bf16.mxu1 %v1447_v23  ;;  %v482_v36 = vpop.f32.mrf.mxu1 }
 0x121   :  { %1123 = vmatprep.mubr.bf16.mxu0 %v489_v29  ;;  %1163 = vmatprep.mubr.bf16.mxu1 %v491_v33 }
 0x123   :  { %1354 = vmatpush3.bf16.msra.mxu0 %v1448_v28  ;;  %1376 = vmatpush3.bf16.msra.mxu1 %v1449_v31 }
 0x124   :  { %1355 = vmatprep.subr.bf16.mxu0 %v1450_v32  ;;  %1377 = vmatprep.subr.bf16.mxu1 %v1451_v35 }
 0x127   :  { %1356 = vmatpush3.bf16.msra.mxu0 %v1452_v38  ;;  %1378 = vmatpush3.bf16.msra.mxu1 %v1453_v41 }
 0x128   :  { %1357 = vmatprep.subr.bf16.mxu0 %v1454_v43  ;;  %1379 = vmatprep.subr.bf16.mxu1 %v1455_v44 }
 0x12b   :  { %1358 = vmatpush3.bf16.msra.mxu0 %v1456_v46  ;;  %1380 = vmatpush3.bf16.msra.mxu1 %v1457_v48 }
 0x12c   :  { %1359 = vmatprep.subr.bf16.mxu0 %v1458_v49  ;;  %1381 = vmatprep.subr.bf16.mxu1 %v1459_v50 }
 0x12f   :  { %1360 = vmatpush3.bf16.msra.mxu0 %v1460_v39  ;;  %1382 = vmatpush3.bf16.msra.mxu1 %v1461_v53 }
 0x132   :  { %1124 = vmatmul.mubr.bf16.vlgmr.msra.gmra.mxu0 %v488_v55  ;;  %1164 = vmatmul.mubr.bf16.vlgmr.msra.gmra.mxu1 %v490_v54 }
 0x1d2   :  { %v1317_v42 = vpop.f32.mrf.mxu0  ;;  %v1339_v56 = vpop.f32.mrf.mxu1 }
 0x1d4   :  { %v1318_v57 = vpop.f32.mrf.mxu0  ;;  %v1340_v58 = vpop.f32.mrf.mxu1 }
 0x1d5   :  { %v1319_v63 = vadd.f32 %v1318_v57, %v1317_v42  ;;  %v1341_v4 = vadd.f32 %v1340_v58, %v1339_v56 }
 0x1d6   :  { %v1320_v59 = vpop.f32.mrf.mxu0  ;;  %v1342_v60 = vpop.f32.mrf.mxu1 }
 0x1d7   :  { %v1046_v2 = vadd.f32 %v1319_v63, %v1234_v0 }
 0x1d8   :  { %v1321_v61 = vpop.f32.mrf.mxu0  ;;  %v1343_v62 = vpop.f32.mrf.mxu1 }
 0x1d9   :  { %v1086_v7 = vadd.f32 %v1341_v4, %v1046_v2 }
 0x1f2   :  { %v1361_v3 = vpop.f32.mrf.mxu0  ;;  %v1383_v5 = vpop.f32.mrf.mxu1 }
 0x1f4   :  { %v1362_v6 = vpop.f32.mrf.mxu0  ;;  %v1384_v1 = vpop.f32.mrf.mxu1 }
 0x1f5   :  { %v1363_v8 = vadd.f32 %v1362_v6, %v1361_v3  ;;  %v1385_v11 = vadd.f32 %v1384_v1, %v1383_v5 }
 0x1f6   :  { %v1364_v9 = vpop.f32.mrf.mxu0  ;;  %v1386_v12 = vpop.f32.mrf.mxu1 }
 0x1f7   :  { %v1126_v10 = vadd.f32 %v1363_v8, %v1086_v7 }
 0x1f8   :  { %v1365_v13 = vpop.f32.mrf.mxu0  ;;  %v1387_v15 = vpop.f32.mrf.mxu1 }
 0x1f9   :  { %v1166_v16 = vadd.f32 %v1385_v11, %v1126_v10 }
 0x1fb   :  { %v1178_v17 = vmul.f32 %v1299_v14, %v1166_v16 }
 0x1fd   :  { %1179 = vadd.xlane.f32.xlu0 %v1178_v17 }
 0x286   :  { %v1180_v19 = vpop.xlane.xlu0 %1179 }
 0x287   :  { %v1188_v20 = vadd.f32 %v1300_v18, %v1180_v19 }
 0x289   :  { %1190 = vst.msk [vmem:[%s1656_s7] sm:$0xff] %vm1189_vm1, %v1188_v20 }
 0x28a   :  { %1195 = vsyncpa [#allocation4], 1 }
 0x28b   :  { %1196 = vsyncpa [#allocation6], 1 }
 0x28c   :  { %1197 = vsyncpa [#allocation9], 1 }

</bundles_post_ra>
